<compile_context>
chip_gen: v5e
topology: v5e:2x2
jax: 0.10.0
libtpu: 0.0.40
codegen_flags: <defaults>
</compile_context>

<pallas_src>
import functools

import jax
import jax.numpy as jnp
from jax.experimental import pallas as pl
from jax.experimental.pallas import tpu as pltpu

TAU = 100.0
V_THRESHOLD = 1.0
V_RESET = 0.0

IN_FEATURES = 28 * 28        # 784
HIDDEN_FEATURES = 14 * 14    # 196
HIDDEN_PAD = 256             # 2 lane-tiles, keeps fc2 contraction (8,128)-aligned
OUT_FEATURES = 10
OUT_PAD = 128                # lane-dense output block


def _round_up(x, m):
    return (x + m - 1) // m * m


def lif_fc_kernel(x_ref, w1_ref, w2_ref, spike_out_ref, *, spike_thresh):
    """One batch tile: fc1 -> LIF -> fc2 -> LIF.

    spike_thresh = tau * (v_threshold - v_reset); the LIF charge step
    v = v_reset + I/tau followed by (v >= v_threshold) is algebraically
    identical to (I >= spike_thresh), so the epilogue is a single compare.
    """
    # x arrives as f32 straight from HBM (no separate wrapper cast pass);
    # cast to bf16 in-register for the MXU feed. VPU cast hides under the DMA.
    x = x_ref[...].astype(jnp.bfloat16)                                   # [TB, 784] bf16
    # fc1 (MXU, bf16 in, f32 accumulate)
    h1 = jnp.dot(x, w1_ref[...], preferred_element_type=jnp.float32)      # [TB, 256] f32
    s1 = (h1 >= spike_thresh).astype(jnp.bfloat16)                        # spikes exact in bf16
    # fc2 (MXU)
    h2 = jnp.dot(s1, w2_ref[...], preferred_element_type=jnp.float32)     # [TB, 128] f32
    # Spikes are exactly 0/1 -> bf16 store is lossless and halves HBM writeback.
    spike_out_ref[...] = (h2 >= spike_thresh).astype(jnp.bfloat16)        # lane-dense store


def prepare_weights(w1, w2, dtype=jnp.bfloat16):
    """One-time weight prep (call at model init, NOT per forward).

    w1: [196, 784], w2: [10, 196] (PyTorch [out, in]).
    Returns w1_t: [784, 256] and w2_t: [256, 128], transposed, zero-padded,
    cast to bf16 so both matmuls are lane-dense and (8,128)-aligned.

    IMPORTANT: padded hidden rows 196:256 of w2_t MUST be zero. Even if the
    padded hidden lanes of h1 (== 0) were to "fire" (possible only when
    spike_thresh <= 0), their zero w2 rows guarantee they contribute nothing
    to the real outputs. Do not change this padding to anything non-zero.
    """
    w1_t = jnp.transpose(w1).astype(dtype)                                 # [784, 196]
    w1_t = jnp.pad(w1_t, ((0, 0), (0, HIDDEN_PAD - HIDDEN_FEATURES)))      # [784, 256]
    w2_t = jnp.transpose(w2).astype(dtype)                                 # [196, 10]
    w2_t = jnp.pad(w2_t, ((0, HIDDEN_PAD - HIDDEN_FEATURES),
                          (0, OUT_PAD - OUT_FEATURES)))                    # [256, 128]
    return w1_t, w2_t


def _choose_batch_tile(B, block_b):
    """Pick (tb, b_pad) with tb | b_pad.

    - B <= 8: block equals the full array dims -> no padding, no (8,128)
      divisibility requirement, grid=(1,).
    - B  > 8: pad only to the next multiple of 8 (<8 extra rows, the minimum
      the sublane layout requires) and pick the largest tile tb <= block_b
      that divides b_pad AND yields >= 2 grid steps, so the 'parallel' batch
      axis shards across both TensorCores on v7x and the x DMA pipelines
      against compute on v5e/v6e. Avoids the old full-array jnp.pad copy up
      to a block_b multiple.
    """
    if B <= 8:
        return B, B
    b_pad = _round_up(B, 8)
    best = 8                           # always valid: b_pad >= 16 -> >= 2 steps
    d = 8
    limit = min(max(block_b, 8), b_pad)
    while d <= limit:
        if b_pad % d == 0 and b_pad // d >= 2:
            best = d
        d += 8
    return best, b_pad


@functools.partial(
    jax.jit, static_argnames=("tau", "v_threshold", "v_reset", "block_b")
)
def net_forward(x_nchw, w1_t, w2_t, tau=TAU, v_threshold=V_THRESHOLD,
                v_reset=V_RESET, block_b=1024):
    """x_nchw: [B, 1, 28, 28].  w1_t/w2_t: outputs of prepare_weights()."""
    B = x_nchw.shape[0]
    # nn.Flatten(); keep f32 here -- the bf16 cast happens inside the kernel,
    # so x is read from HBM exactly once (no standalone cast pass over x).
    x_flat = x_nchw.reshape(B, -1).astype(jnp.float32)

    tb, b_pad = _choose_batch_tile(B, block_b)
    if b_pad != B:
        # Only the unavoidable sublane pad (< 8 rows), hit when B % 8 != 0.
        x_flat = jnp.pad(x_flat, ((0, b_pad - B), (0, 0)))

    spike_thresh = float(tau) * (float(v_threshold) - float(v_reset))
    kernel = functools.partial(lif_fc_kernel, spike_thresh=spike_thresh)

    # Advisory cost for the XLA scheduler (overlap with surrounding ops).
    flops = 2 * b_pad * (IN_FEATURES * HIDDEN_PAD + HIDDEN_PAD * OUT_PAD)
    bytes_accessed = (b_pad * IN_FEATURES * 4            # x (f32)
                      + IN_FEATURES * HIDDEN_PAD * 2     # w1 (bf16)
                      + HIDDEN_PAD * OUT_PAD * 2         # w2 (bf16)
                      + b_pad * OUT_PAD * 2)             # out (bf16)

    out_padded = pl.pallas_call(
        kernel,
        out_shape=jax.ShapeDtypeStruct((b_pad, OUT_PAD), jnp.bfloat16),
        grid_spec=pltpu.PrefetchScalarGridSpec(
            num_scalar_prefetch=0,
            grid=(b_pad // tb,),
            in_specs=[
                # x: one batch tile per grid step (DMA pipelined against fc1).
                pl.BlockSpec((tb, IN_FEATURES), lambda i: (i, 0)),
                # weights: same block every step -> stay resident in VMEM.
                pl.BlockSpec((IN_FEATURES, HIDDEN_PAD), lambda i: (0, 0)),
                pl.BlockSpec((HIDDEN_PAD, OUT_PAD), lambda i: (0, 0)),
            ],
            out_specs=pl.BlockSpec((tb, OUT_PAD), lambda i: (i, 0)),
        ),
        compiler_params=pltpu.CompilerParams(
            dimension_semantics=("parallel",),   # megacore-shard batch tiles (v7x)
        ),
        cost_estimate=pl.CostEstimate(
            flops=flops, transcendentals=0, bytes_accessed=bytes_accessed),
    )(x_flat, w1_t, w2_t)

    # Strip batch padding and lane padding; spikes are exact 0/1 in bf16,
    # upcast the tiny [B,10] slice back to f32 for the PyTorch-like API.
    return out_padded[:B, :OUT_FEATURES].astype(jnp.float32)


def net_forward_reference(x_nchw, w1, w2, tau=TAU, v_threshold=V_THRESHOLD,
                          v_reset=V_RESET):
    """Pure-JAX reference mirroring the PyTorch forward (same bf16 matmul feed)."""
    B = x_nchw.shape[0]
    x = x_nchw.reshape(B, -1).astype(jnp.bfloat16)
    thresh = tau * (v_threshold - v_reset)       # charge folded into threshold
    h1 = jnp.dot(x, jnp.transpose(w1).astype(jnp.bfloat16),
                 preferred_element_type=jnp.float32)
    s1 = (h1 >= thresh).astype(jnp.bfloat16)
    h2 = jnp.dot(s1, jnp.transpose(w2).astype(jnp.bfloat16),
                 preferred_element_type=jnp.float32)
    s2 = (h2 >= thresh).astype(jnp.float32)
    return s2


if __name__ == "__main__":
    key = jax.random.PRNGKey(0)
    kx, kw1, kw2 = jax.random.split(key, 3)

    # Small batch, MNIST-shaped input (Linear(784, ...) fixes C=1, H=W=28).
    B = 2
    x = jax.random.uniform(kx, (B, 1, 28, 28), dtype=jnp.float32)

    # PyTorch-default-style init: U(-1/sqrt(in), 1/sqrt(in)), bias=False.
    b1 = 1.0 / (IN_FEATURES ** 0.5)
    b2 = 1.0 / (HIDDEN_FEATURES ** 0.5)
    w1 = jax.random.uniform(kw1, (HIDDEN_FEATURES, IN_FEATURES),
                            minval=-b1, maxval=b1, dtype=jnp.float32)
    w2 = jax.random.uniform(kw2, (OUT_FEATURES, HIDDEN_FEATURES),
                            minval=-b2, maxval=b2, dtype=jnp.float32)

    # One-time weight relayout (model-init time), then the jitted forward.
    w1_t, w2_t = prepare_weights(w1, w2)

    out = net_forward(x, w1_t, w2_t)
    out = jax.block_until_ready(out)

    ref = net_forward_reference(x, w1, w2)
    assert out.shape == (B, OUT_FEATURES), out.shape
    assert out.dtype == jnp.float32, out.dtype
    # Spikes are discrete 0/1; with these inputs/weights both paths agree exactly.
    assert jnp.array_equal(out, ref), (out, ref)

    print("KERNEL_OK")
</pallas_src>

<mosaic_0001>
module attributes {stable_mosaic.version = 11 : i64} {
  func.func @lif_fc_kernel(%arg0: i32, %arg1: memref<2x784xf32, #tpu.memory_space<vmem>>, %arg2: memref<784x256xbf16, #tpu.memory_space<vmem>>, %arg3: memref<256x128xbf16, #tpu.memory_space<vmem>>, %arg4: memref<2x128xbf16, #tpu.memory_space<vmem>>) attributes {dimension_semantics = [#tpu.dimension_semantics<parallel>], iteration_bounds = array<i64: 1>, scalar_prefetch = 0 : i64, scratch_operands = 0 : i64, tpu.core_type = #tpu.core_type<tc>, window_params = [{transform_indices = @transform_0, window_bounds = array<i64: 2, 784>}, {pipeline_mode = #tpu.pipeline_mode<synchronous>, transform_indices = @transform_1, window_bounds = array<i64: 784, 256>}, {pipeline_mode = #tpu.pipeline_mode<synchronous>, transform_indices = @transform_2, window_bounds = array<i64: 256, 128>}, {transform_indices = @transform_3, window_bounds = array<i64: 2, 128>}]} {
    %c0 = arith.constant 0 : index
    %c0_0 = arith.constant 0 : index
    %0 = vector.load %arg1[%c0, %c0_0] : memref<2x784xf32, #tpu.memory_space<vmem>>, vector<2x784xf32>
    %1 = arith.truncf %0 : vector<2x784xf32> to vector<2x784xbf16>
    %c0_1 = arith.constant 0 : index
    %c0_2 = arith.constant 0 : index
    %2 = vector.load %arg2[%c0_1, %c0_2] : memref<784x256xbf16, #tpu.memory_space<vmem>>, vector<784x256xbf16>
    %cst = arith.constant dense<0.000000e+00> : vector<2x256xf32>
    %3 = tpu.matmul %1, %2, %cst {dimension_numbers = #tpu.dot_dimension_numbers<[1], [0], [0], [1], [0, 0, 1, 1], [], []>} : vector<2x784xbf16>, vector<784x256xbf16>, vector<2x256xf32> -> vector<2x256xf32>
    %cst_3 = arith.constant 1.000000e+02 : f32
    %4 = vector.broadcast %cst_3 : f32 to vector<2x256xf32>
    %5 = arith.cmpf oge, %3, %4 : vector<2x256xf32>
    %6 = arith.extui %5 : vector<2x256xi1> to vector<2x256xi32>
    %7 = arith.sitofp %6 : vector<2x256xi32> to vector<2x256xf32>
    %8 = arith.truncf %7 : vector<2x256xf32> to vector<2x256xbf16>
    %c0_4 = arith.constant 0 : index
    %c0_5 = arith.constant 0 : index
    %9 = vector.load %arg3[%c0_4, %c0_5] : memref<256x128xbf16, #tpu.memory_space<vmem>>, vector<256x128xbf16>
    %cst_6 = arith.constant dense<0.000000e+00> : vector<2x128xf32>
    %10 = tpu.matmul %8, %9, %cst_6 {dimension_numbers = #tpu.dot_dimension_numbers<[1], [0], [0], [1], [0, 0, 1, 1], [], []>} : vector<2x256xbf16>, vector<256x128xbf16>, vector<2x128xf32> -> vector<2x128xf32>
    %cst_7 = arith.constant 1.000000e+02 : f32
    %11 = vector.broadcast %cst_7 : f32 to vector<2x128xf32>
    %12 = arith.cmpf oge, %10, %11 : vector<2x128xf32>
    %13 = arith.extui %12 : vector<2x128xi1> to vector<2x128xi32>
    %14 = arith.sitofp %13 : vector<2x128xi32> to vector<2x128xf32>
    %15 = arith.truncf %14 : vector<2x128xf32> to vector<2x128xbf16>
    %c0_8 = arith.constant 0 : index
    %c0_9 = arith.constant 0 : index
    %16 = vector.load %arg4[%c0_8, %c0_9] : memref<2x128xbf16, #tpu.memory_space<vmem>>, vector<2x128xbf16>
    tpu.vector_store %arg4[%c0_8, %c0_9], %15 {strides = array<i32>} : memref<2x128xbf16, #tpu.memory_space<vmem>>, vector<2x128xbf16>,
    return
  }
  func.func @transform_0(%arg0: i32) -> (i32, i32) {
    %c0_i32 = arith.constant 0 : i32
    %c0_i32_0 = arith.constant 0 : i32
    return %arg0, %c0_i32 : i32, i32
  }
  func.func @transform_1(%arg0: i32) -> (i32, i32) {
    %c0_i32 = arith.constant 0 : i32
    %c0_i32_0 = arith.constant 0 : i32
    %c0_i32_1 = arith.constant 0 : i32
    return %c0_i32, %c0_i32_0 : i32, i32
  }
  func.func @transform_2(%arg0: i32) -> (i32, i32) {
    %c0_i32 = arith.constant 0 : i32
    %c0_i32_0 = arith.constant 0 : i32
    %c0_i32_1 = arith.constant 0 : i32
    return %c0_i32, %c0_i32_0 : i32, i32
  }
  func.func @transform_3(%arg0: i32) -> (i32, i32) {
    %c0_i32 = arith.constant 0 : i32
    %c0_i32_0 = arith.constant 0 : i32
    return %arg0, %c0_i32 : i32, i32
  }
}

</mosaic_0001>

<bundles_post_ra>
// kernel: net_forward.1
= control target key start
LH: loop header
LB: loop body
LE: loop exit
PB: predicated region body
PF: predicated region fallthrough
CT: control target
= control target key end

     0   :  { %8 = vsyncpa [#allocation3], 0  ;;  %s1615_s15 = smov [#allocation2]   ;;  %s1616_s17 = smov 128   ;;  %s1730_s0 = inlined_call_operand.vmem [shape: f32[2,784], index: 0, kind: input, shape index: {}]   ;;  %s1731_s1 = inlined_call_operand.hbm [shape: bf16[784,256], index: 1, kind: input, shape index: {}]   ;;  %s1732_s2 = inlined_call_operand.vmem [shape: bf16[256,128], index: 2, kind: input, shape index: {}]   ;;  %s1733_s3 = inlined_call_operand.vmem [shape: bf16[2,128], index: 3, kind: output, shape index: {}]  }
   0x1   :  { %s15_s14 = sshll.u32 %s1731_s1, 4  ;;  %s17_s16 = sshll.u32 %s1615_s15, 4  ;;  %s16_s14 = int_to_ptr.hbm [resolvable:$true] %s15_s14  ;;  %s18_s16 = int_to_ptr.vmem [resolvable:$true] %s17_s16 }
   0x2   :  { %s1617_s18 = smov 8  }
   0x3   :  { %23 = dma.hbm_to_vmem [thread:$0]  %s16_s14, 12544, %s18_s16, [#allocation3], %s1616_s17, %s1616_s17, %s1617_s18  }
   0x4   :  { %1613 = dma.done.wait [#allocation3], 12544  }
   0x5   :  { %1614 = vsyncadd [#allocation3], 4294954752  ;;  %v1063_v0 = vld [vmem:[#allocation2 + $0x70] sm:$0xf]  ;;  %v1485_v1 = vld [vmem:[#allocation2 + $0x74] sm:$0xf0] }
   0x6   :  { %v1191_v2 = vld [vmem:[#allocation2 + $0x170] sm:$0xf]  ;;  %v1064_v3 = vor.u32 %v1485_v1, %v1063_v0  ;;  %v1517_v4 = vld [vmem:[#allocation2 + $0x174] sm:$0xf0]  ;;  %v1055_v11 = vld [vmem:[#allocation2 + $0x60] sm:$0xf] }
   0x7   :  { %v1255_v5 = vld [vmem:[#allocation2 + $0x1f0] sm:$0xf]  ;;  %v1533_v6 = vld [vmem:[#allocation2 + $0x1f4] sm:$0xf0]  ;;  %v1192_v7 = vor.u32 %v1517_v4, %v1191_v2  ;;  %v1483_v13 = vld [vmem:[#allocation2 + $0x64] sm:$0xf0] }
   0x8   :  { %v1256_v8 = vor.u32 %v1533_v6, %v1255_v5  ;;  %v1127_v9 = vld [vmem:[#allocation2 + $0xf0] sm:$0xf]  ;;  %v1501_v10 = vld [vmem:[#allocation2 + $0xf4] sm:$0xf0]  ;;  %651 = vmatpush.bf16.msra.mxu0 %v1064_v3  ;;  %v1183_v14 = vld [vmem:[#allocation2 + $0x160] sm:$0xf]  ;;  %v1056_v16 = vor.u32 %v1483_v13, %v1055_v11 }
   0x9   :  { %v1128_v12 = vor.u32 %v1501_v10, %v1127_v9  ;;  %v1515_v15 = vld [vmem:[#allocation2 + $0x164] sm:$0xf0]  ;;  %677 = vmatpush.bf16.msra.mxu2 %v1192_v7  ;;  %v1247_v18 = vld [vmem:[#allocation2 + $0x1e0] sm:$0xf]  ;;  %v1047_v23 = vld [vmem:[#allocation2 + $0x50] sm:$0xf] }
   0xa   :  { %690 = vmatpush.bf16.msra.mxu3 %v1256_v8  ;;  %v1184_v17 = vor.u32 %v1515_v15, %v1183_v14  ;;  %v1531_v19 = vld [vmem:[#allocation2 + $0x1e4] sm:$0xf0]  ;;  %v1119_v20 = vld [vmem:[#allocation2 + $0xe0] sm:$0xf]  ;;  %v1481_v24 = vld [vmem:[#allocation2 + $0x54] sm:$0xf0] }
   0xb   :  { %664 = vmatpush.bf16.msra.mxu1 %v1128_v12  ;;  %v1248_v21 = vor.u32 %v1531_v19, %v1247_v18  ;;  %v1499_v22 = vld [vmem:[#allocation2 + $0xe4] sm:$0xf0]  ;;  %v1175_v26 = vld [vmem:[#allocation2 + $0x150] sm:$0xf]  ;;  %v1513_v27 = vld [vmem:[#allocation2 + $0x154] sm:$0xf0]  ;;  %v1048_v29 = vor.u32 %v1481_v24, %v1047_v23 }
   0xc   :  { %v1120_v25 = vor.u32 %v1499_v22, %v1119_v20  ;;  %v1239_v28 = vld [vmem:[#allocation2 + $0x1d0] sm:$0xf]  ;;  %652 = vmatpush.bf16.msra.mxu0 %v1056_v16  ;;  %v1529_v30 = vld [vmem:[#allocation2 + $0x1d4] sm:$0xf0]  ;;  %v1176_v33 = vor.u32 %v1513_v27, %v1175_v26  ;;  %v1039_v35 = vld [vmem:[#allocation2 + $0x40] sm:$0xf] }
   0xd   :  { %v1111_v31 = vld [vmem:[#allocation2 + $0xd0] sm:$0xf]  ;;  %v1497_v32 = vld [vmem:[#allocation2 + $0xd4] sm:$0xf0]  ;;  %678 = vmatpush.bf16.msra.mxu2 %v1184_v17  ;;  %v1240_v34 = vor.u32 %v1529_v30, %v1239_v28  ;;  %v1479_v36 = vld [vmem:[#allocation2 + $0x44] sm:$0xf0] }
   0xe   :  { %691 = vmatpush.bf16.msra.mxu3 %v1248_v21  ;;  %v1167_v37 = vld [vmem:[#allocation2 + $0x140] sm:$0xf]  ;;  %v1112_v38 = vor.u32 %v1497_v32, %v1111_v31  ;;  %v1511_v39 = vld [vmem:[#allocation2 + $0x144] sm:$0xf0]  ;;  %v1040_v44 = vor.u32 %v1479_v36, %v1039_v35  ;;  %v1031_v47 = vld [vmem:[#allocation2 + $0x30] sm:$0xf] }
   0xf   :  { %665 = vmatpush.bf16.msra.mxu1 %v1120_v25  ;;  %v1231_v40 = vld [vmem:[#allocation2 + $0x1c0] sm:$0xf]  ;;  %v1527_v41 = vld [vmem:[#allocation2 + $0x1c4] sm:$0xf0]  ;;  %v1168_v45 = vor.u32 %v1511_v39, %v1167_v37  ;;  %v1477_v48 = vld [vmem:[#allocation2 + $0x34] sm:$0xf0] }
  0x10   :  { %v1103_v42 = vld [vmem:[#allocation2 + $0xc0] sm:$0xf]  ;;  %v1495_v43 = vld [vmem:[#allocation2 + $0xc4] sm:$0xf0]  ;;  %653 = vmatpush.bf16.msra.mxu0 %v1048_v29  ;;  %v1232_v46 = vor.u32 %v1527_v41, %v1231_v40  ;;  %v1159_v49 = vld [vmem:[#allocation2 + $0x130] sm:$0xf]  ;;  %v1032_v56 = vor.u32 %v1477_v48, %v1031_v47 }
  0x11   :  { %679 = vmatpush.bf16.msra.mxu2 %v1176_v33  ;;  %v1104_v50 = vor.u32 %v1495_v43, %v1103_v42  ;;  %v1509_v51 = vld [vmem:[#allocation2 + $0x134] sm:$0xf0]  ;;  %v1223_v52 = vld [vmem:[#allocation2 + $0x1b0] sm:$0xf]  ;;  %v1023_v59 = vld [vmem:[#allocation2 + $0x20] sm:$0xf] }
  0x12   :  { %692 = vmatpush.bf16.msra.mxu3 %v1240_v34  ;;  %v1525_v53 = vld [vmem:[#allocation2 + $0x1b4] sm:$0xf0]  ;;  %v1095_v54 = vld [vmem:[#allocation2 + $0xb0] sm:$0xf]  ;;  %v1160_v57 = vor.u32 %v1509_v51, %v1159_v49  ;;  %v1475_v60 = vld [vmem:[#allocation2 + $0x24] sm:$0xf0] }
  0x13   :  { %666 = vmatpush.bf16.msra.mxu1 %v1112_v38  ;;  %v1493_v55 = vld [vmem:[#allocation2 + $0xb4] sm:$0xf0]  ;;  %v1224_v58 = vor.u32 %v1525_v53, %v1223_v52  ;;  %v1151_v61 = vld [vmem:[#allocation2 + $0x120] sm:$0xf]  ;;  %v1507_v63 = vld [vmem:[#allocation2 + $0x124] sm:$0xf0]  ;;  %v1024_v4 = vor.u32 %v1475_v60, %v1023_v59 }
  0x14   :  { %654 = vmatpush.bf16.msra.mxu0 %v1040_v44  ;;  %v1096_v62 = vor.u32 %v1493_v55, %v1095_v54  ;;  %v1215_v0 = vld [vmem:[#allocation2 + $0x1a0] sm:$0xf]  ;;  %v1523_v1 = vld [vmem:[#allocation2 + $0x1a4] sm:$0xf0]  ;;  %v1015_v5 = vld [vmem:[#allocation2 + $0x10] sm:$0xf]  ;;  %v1152_v7 = vor.u32 %v1507_v63, %v1151_v61 }
  0x15   :  { %680 = vmatpush.bf16.msra.mxu2 %v1168_v45  ;;  %v1087_v2 = vld [vmem:[#allocation2 + $0xa0] sm:$0xf]  ;;  %v1491_v3 = vld [vmem:[#allocation2 + $0xa4] sm:$0xf0]  ;;  %v1473_v6 = vld [vmem:[#allocation2 + $0x14] sm:$0xf0]  ;;  %v1216_v8 = vor.u32 %v1523_v1, %v1215_v0 }
  0x16   :  { %693 = vmatpush.bf16.msra.mxu3 %v1232_v46  ;;  %v1143_v9 = vld [vmem:[#allocation2 + $0x110] sm:$0xf]  ;;  %v1505_v10 = vld [vmem:[#allocation2 + $0x114] sm:$0xf0]  ;;  %v1088_v12 = vor.u32 %v1491_v3, %v1087_v2  ;;  %v1007_v16 = vld [vmem:[#allocation2] sm:$0xf]  ;;  %v1016_v19 = vor.u32 %v1473_v6, %v1015_v5 }
  0x17   :  { %667 = vmatpush.bf16.msra.mxu1 %v1104_v50  ;;  %v1207_v11 = vld [vmem:[#allocation2 + $0x190] sm:$0xf]  ;;  %v1521_v13 = vld [vmem:[#allocation2 + $0x194] sm:$0xf0]  ;;  %v1471_v17 = vld [vmem:[#allocation2 + $0x4] sm:$0xf0]  ;;  %v1144_v22 = vor.u32 %v1505_v10, %v1143_v9 }
  0x18   :  { %655 = vmatpush.bf16.msra.mxu0 %v1032_v56  ;;  %v1079_v14 = vld [vmem:[#allocation2 + $0x90] sm:$0xf]  ;;  %v1489_v15 = vld [vmem:[#allocation2 + $0x94] sm:$0xf0]  ;;  %v1135_v20 = vld [vmem:[#allocation2 + $0x100] sm:$0xf]  ;;  %v1208_v23 = vor.u32 %v1521_v13, %v1207_v11  ;;  %v1008_v34 = vor.u32 %v1471_v17, %v1007_v16 }
  0x19   :  { %681 = vmatpush.bf16.msra.mxu2 %v1160_v57  ;;  %v31_v18 = vld [vmem:[%s1730_s0] sm:$0xff]  ;;  %v1503_v21 = vld [vmem:[#allocation2 + $0x104] sm:$0xf0]  ;;  %v1199_v24 = vld [vmem:[#allocation2 + $0x180] sm:$0xf]  ;;  %v1080_v27 = vor.u32 %v1489_v15, %v1079_v14  ;;  %vm647_vm0 = vcmask 130048  }
  0x1a   :  { %694 = vmatpush.bf16.msra.mxu3 %v1224_v58  ;;  %35 = vst [vmem:[#allocation1] ss:$4 sm:$0xff] %v31_v18  ;;  %v1519_v25 = vld [vmem:[#allocation2 + $0x184] sm:$0xf0]  ;;  %v1319_v26 = vld [vmem:[#allocation2 + $0x270] sm:$0xf]  ;;  %v1136_v38 = vor.u32 %v1503_v21, %v1135_v20 }
  0x1b   :  { %668 = vmatpush.bf16.msra.mxu1 %v1096_v62  ;;  %v1549_v28 = vld [vmem:[#allocation2 + $0x274] sm:$0xf0]  ;;  %v1484_v29 = vld [vmem:[#allocation2 + $0x74] sm:$0xf]  ;;  %v1065_v30 = vld [vmem:[#allocation2 + $0x78] sm:$0xf0]  ;;  %v1200_v39 = vor.u32 %v1519_v25, %v1199_v24 }
  0x1c   :  { %656 = vmatpush.bf16.msra.mxu0 %v1024_v4  ;;  %v1071_v31 = vld [vmem:[#allocation2 + $0x80] sm:$0xf]  ;;  %v1487_v32 = vld [vmem:[#allocation2 + $0x84] sm:$0xf0]  ;;  %v1383_v33 = vld [vmem:[#allocation2 + $0x2f0] sm:$0xf]  ;;  %v1320_v43 = vor.u32 %v1549_v28, %v1319_v26  ;;  %v1068_v44 = vor.u32 %v1484_v29, %v1065_v30 }
  0x1d   :  { %682 = vmatpush.bf16.msra.mxu2 %v1152_v7  ;;  %v1565_v35 = vld [vmem:[#allocation2 + $0x2f4] sm:$0xf0]  ;;  %v1391_v36 = vld [vmem:[#allocation2 + $0x300] sm:$0xf]  ;;  %v1567_v37 = vld [vmem:[#allocation2 + $0x304] sm:$0xf0]  ;;  %v1072_v48 = vor.u32 %v1487_v32, %v1071_v31 }
  0x1e   :  { %695 = vmatpush.bf16.msra.mxu3 %v1216_v8  ;;  %v1500_v40 = vld [vmem:[#allocation2 + $0xf4] sm:$0xf]  ;;  %v1129_v41 = vld [vmem:[#allocation2 + $0xf8] sm:$0xf0]  ;;  %v1311_v42 = vld [vmem:[#allocation2 + $0x260] sm:$0xf]  ;;  %v1392_v50 = vor.u32 %v1567_v37, %v1391_v36  ;;  %v1384_v53 = vor.u32 %v1565_v35, %v1383_v33 }
  0x1f   :  { %669 = vmatpush.bf16.msra.mxu1 %v1088_v12  ;;  %v1547_v45 = vld [vmem:[#allocation2 + $0x264] sm:$0xf0]  ;;  %v1482_v46 = vld [vmem:[#allocation2 + $0x64] sm:$0xf]  ;;  %v1057_v47 = vld [vmem:[#allocation2 + $0x68] sm:$0xf0]  ;;  %v1132_v56 = vor.u32 %v1500_v40, %v1129_v41 }
  0x20   :  { %657 = vmatpush.bf16.msra.mxu0 %v1016_v19  ;;  %v1375_v54 = vld [vmem:[#allocation2 + $0x2e0] sm:$0xf]  ;;  %v1563_v55 = vld [vmem:[#allocation2 + $0x2e4] sm:$0xf0]  ;;  %v1312_v60 = vor.u32 %v1547_v45, %v1311_v42  ;;  %v1060_v61 = vor.u32 %v1482_v46, %v1057_v47  ;;  %v1498_v62 = vld [vmem:[#allocation2 + $0xe4] sm:$0xf] }
  0x21   :  { %683 = vmatpush.bf16.msra.mxu2 %v1144_v22  ;;  %v40_v49 = vld.sshfl [vmem:[#allocation1 + $0x10] sm:$0xff pattern:$0x73625140]  ;;  %v41_v51 = vld.sshfl [vmem:[#allocation1 + $0x18] sm:$0xff pattern:$0x73625140]  ;;  %v1376_v6 = vor.u32 %v1563_v55, %v1375_v54 }
  0x22   :  { %696 = vmatpush.bf16.msra.mxu3 %v1208_v23  ;;  %v1646_v52 = vpack.c.bf16 %v40_v49, %v40_v49  ;;  %v1648_v57 = vpack.c.bf16 %v41_v51, %v41_v51  ;;  %v38_v58 = vld.sshfl [vmem:[#allocation1] sm:$0xff pattern:$0x73625140]  ;;  %v39_v59 = vld.sshfl [vmem:[#allocation1 + $0x8] sm:$0xff pattern:$0x73625140] }
  0x23   :  { %670 = vmatpush.bf16.msra.mxu1 %v1080_v27  ;;  %v1121_v63 = vld [vmem:[#allocation2 + $0xe8] sm:$0xf0]  ;;  %v1303_v0 = vld [vmem:[#allocation2 + $0x250] sm:$0xf]  ;;  %v1545_v1 = vld [vmem:[#allocation2 + $0x254] sm:$0xf0]  ;;  %v1650_v4 = vpack.c.bf16 %v38_v58, %v38_v58  ;;  %v1652_v5 = vpack.c.bf16 %v39_v59, %v39_v59 }
  0x24   :  { %658 = vmatpush.bf16.msra.mxu0 %v1008_v34  ;;  %v1480_v2 = vld [vmem:[#allocation2 + $0x54] sm:$0xf]  ;;  %v1049_v3 = vld [vmem:[#allocation2 + $0x58] sm:$0xf0]  ;;  %v1124_v7 = vor.u32 %v1498_v62, %v1121_v63  ;;  %v1367_v8 = vld [vmem:[#allocation2 + $0x2d0] sm:$0xf]  ;;  %v1304_v10 = vor.u32 %v1545_v1, %v1303_v0 }
  0x25   :  { %684 = vmatpush.bf16.msra.mxu2 %v1136_v38  ;;  %v1561_v9 = vld [vmem:[#allocation2 + $0x2d4] sm:$0xf0]  ;;  %v1052_v11 = vor.u32 %v1480_v2, %v1049_v3  ;;  %v1496_v12 = vld [vmem:[#allocation2 + $0xd4] sm:$0xf]  ;;  %v1113_v13 = vld [vmem:[#allocation2 + $0xd8] sm:$0xf0] }
  0x26   :  { %697 = vmatpush.bf16.msra.mxu3 %v1200_v39  ;;  %v1295_v14 = vld [vmem:[#allocation2 + $0x240] sm:$0xf]  ;;  %v1543_v15 = vld [vmem:[#allocation2 + $0x244] sm:$0xf0]  ;;  %v1478_v16 = vld [vmem:[#allocation2 + $0x44] sm:$0xf]  ;;  %v1368_v18 = vor.u32 %v1561_v9, %v1367_v8  ;;  %v1116_v19 = vor.u32 %v1496_v12, %v1113_v13 }
  0x27   :  { %671 = vmatpush.bf16.msra.mxu1 %v1072_v48  ;;  %659 = vmatmul.bf16.vlgmr.msra.gmra.mxu0 %v1650_v4  ;;  %v1041_v17 = vld [vmem:[#allocation2 + $0x48] sm:$0xf0]  ;;  %v1359_v20 = vld [vmem:[#allocation2 + $0x2c0] sm:$0xf]  ;;  %v1559_v21 = vld [vmem:[#allocation2 + $0x2c4] sm:$0xf0]  ;;  %v1296_v22 = vor.u32 %v1543_v15, %v1295_v14 }
  0x28   :  { %703 = vmatpush.bf16.msrb.mxu0 %v1320_v43  ;;  %685 = vmatmul.bf16.vlgmr.msra.gmra.mxu2 %v1646_v52  ;;  %v1044_v23 = vor.u32 %v1478_v16, %v1041_v17  ;;  %v1494_v24 = vld [vmem:[#allocation2 + $0xc4] sm:$0xf]  ;;  %v1105_v25 = vld [vmem:[#allocation2 + $0xc8] sm:$0xf0]  ;;  %v1287_v26 = vld [vmem:[#allocation2 + $0x230] sm:$0xf]  ;;  %v1360_v30 = vor.u32 %v1559_v21, %v1359_v20 }
  0x29   :  { %736 = vmatpush.bf16.msrb.mxu2 %v1392_v50  ;;  %698 = vmatmul.bf16.vlgmr.msra.gmra.mxu3 %v1648_v57  ;;  %v1541_v27 = vld [vmem:[#allocation2 + $0x234] sm:$0xf0]  ;;  %v1476_v28 = vld [vmem:[#allocation2 + $0x34] sm:$0xf]  ;;  %v1033_v29 = vld [vmem:[#allocation2 + $0x38] sm:$0xf0]  ;;  %v1108_v32 = vor.u32 %v1494_v24, %v1105_v25 }
  0x2a   :  { %742 = vmatpush.bf16.msrb.mxu3 %v1068_v44  ;;  %672 = vmatmul.bf16.vlgmr.msra.gmra.mxu1 %v1652_v5  ;;  %v1351_v31 = vld [vmem:[#allocation2 + $0x2b0] sm:$0xf]  ;;  %v1557_v33 = vld [vmem:[#allocation2 + $0x2b4] sm:$0xf0]  ;;  %v1492_v34 = vld [vmem:[#allocation2 + $0xb4] sm:$0xf]  ;;  %v1288_v36 = vor.u32 %v1541_v27, %v1287_v26  ;;  %v1036_v37 = vor.u32 %v1476_v28, %v1033_v29 }
  0x2b   :  { %716 = vmatpush.bf16.msrb.mxu1 %v1384_v53  ;;  %v32_v35 = vld [vmem:[%s1730_s0 + $0x8] sm:$0x3f]  ;;  %v1097_v38 = vld [vmem:[#allocation2 + $0xb8] sm:$0xf0]  ;;  %v1539_v40 = vld [vmem:[#allocation2 + $0x224] sm:$0xf0]  ;;  %v1352_v43 = vor.u32 %v1557_v33, %v1351_v31 }
  0x2c   :  { %704 = vmatpush.bf16.msrb.mxu0 %v1312_v60  ;;  %v1279_v39 = vld [vmem:[#allocation2 + $0x220] sm:$0xf]  ;;  %37 = vst [vmem:[#allocation1 + $0x20] ss:$4 sm:$0xff] %v32_v35  ;;  %v1474_v41 = vld [vmem:[#allocation2 + $0x24] sm:$0xf]  ;;  %v1100_v44 = vor.u32 %v1492_v34, %v1097_v38 }
  0x2d   :  { %755 = vmatpush.bf16.msra.mxu2 %v1132_v56  ;;  %v1025_v42 = vld [vmem:[#allocation2 + $0x28] sm:$0xf0]  ;;  %v1343_v45 = vld [vmem:[#allocation2 + $0x2a0] sm:$0xf]  ;;  %v1555_v46 = vld [vmem:[#allocation2 + $0x2a4] sm:$0xf0]  ;;  %v1280_v48 = vor.u32 %v1539_v40, %v1279_v39 }
  0x2e   :  { %743 = vmatpush.bf16.msrb.mxu3 %v1060_v61  ;;  %v1490_v47 = vld [vmem:[#allocation2 + $0xa4] sm:$0xf]  ;;  %v1028_v49 = vor.u32 %v1474_v41, %v1025_v42  ;;  %v1089_v50 = vld [vmem:[#allocation2 + $0xa8] sm:$0xf0]  ;;  %v1271_v51 = vld [vmem:[#allocation2 + $0x210] sm:$0xf]  ;;  %v1344_v58 = vor.u32 %v1555_v46, %v1343_v45 }
  0x2f   :  { %717 = vmatpush.bf16.msrb.mxu1 %v1376_v6  ;;  %v1537_v53 = vld [vmem:[#allocation2 + $0x214] sm:$0xf0]  ;;  %v1472_v54 = vld [vmem:[#allocation2 + $0x14] sm:$0xf]  ;;  %v1017_v55 = vld [vmem:[#allocation2 + $0x18] sm:$0xf0]  ;;  %v1092_v62 = vor.u32 %v1490_v47, %v1089_v50 }
  0x30   :  { %705 = vmatpush.bf16.msrb.mxu0 %v1304_v10  ;;  %v1335_v56 = vld [vmem:[#allocation2 + $0x290] sm:$0xf]  ;;  %v1553_v59 = vld [vmem:[#allocation2 + $0x294] sm:$0xf0]  ;;  %v1488_v60 = vld [vmem:[#allocation2 + $0x94] sm:$0xf]  ;;  %v1272_v1 = vor.u32 %v1537_v53, %v1271_v51  ;;  %v1020_v2 = vor.u32 %v1472_v54, %v1017_v55 }
  0x31   :  { %756 = vmatpush.bf16.msra.mxu2 %v1124_v7  ;;  %v1081_v61 = vld [vmem:[#allocation2 + $0x98] sm:$0xf0]  ;;  %v1263_v63 = vld [vmem:[#allocation2 + $0x200] sm:$0xf]  ;;  %v1535_v3 = vld [vmem:[#allocation2 + $0x204] sm:$0xf0]  ;;  %v1336_v12 = vor.u32 %v1553_v59, %v1335_v56 }
  0x32   :  { %744 = vmatpush.bf16.msrb.mxu3 %v1052_v11  ;;  %v1470_v7 = vld [vmem:[#allocation2 + $0x4] sm:$0xf]  ;;  %v1009_v8 = vld [vmem:[#allocation2 + $0x8] sm:$0xf0]  ;;  %v1516_v9 = vld [vmem:[#allocation2 + $0x174] sm:$0xf]  ;;  %v1084_v16 = vor.u32 %v1488_v60, %v1081_v61  ;;  %v1264_v20 = vor.u32 %v1535_v3, %v1263_v63 }
  0x33   :  { %718 = vmatpush.bf16.msrb.mxu1 %v1368_v18  ;;  %v44_v0 = vld.sshfl [vmem:[#allocation1 + $0x30] sm:$0xff pattern:$0x73625140]  ;;  %v1193_v10 = vld [vmem:[#allocation2 + $0x178] sm:$0xf0]  ;;  %v1012_v21 = vor.u32 %v1470_v7, %v1009_v8 }
  0x34   :  { %706 = vmatpush.bf16.msrb.mxu0 %v1296_v22  ;;  %v1661_v6 = vpack.c.bf16 %v44_v0, %v44_v0  ;;  %v1548_v11 = vld [vmem:[#allocation2 + $0x274] sm:$0xf]  ;;  %v1321_v13 = vld [vmem:[#allocation2 + $0x278] sm:$0xf0]  ;;  %v1327_v14 = vld [vmem:[#allocation2 + $0x280] sm:$0xf]  ;;  %v1196_v24 = vor.u32 %v1516_v9, %v1193_v10 }
  0x35   :  { %757 = vmatpush.bf16.msra.mxu2 %v1116_v19  ;;  %v1551_v15 = vld [vmem:[#allocation2 + $0x284] sm:$0xf0]  ;;  %v1486_v17 = vld [vmem:[#allocation2 + $0x84] sm:$0xf]  ;;  %v1073_v18 = vld [vmem:[#allocation2 + $0x88] sm:$0xf0]  ;;  %v1324_v25 = vor.u32 %v1548_v11, %v1321_v13 }
  0x36   :  { %745 = vmatpush.bf16.msrb.mxu3 %v1044_v23  ;;  %v1532_v19 = vld [vmem:[#allocation2 + $0x1f4] sm:$0xf]  ;;  %v42_v22 = vld.sshfl [vmem:[#allocation1 + $0x20] sm:$0xff pattern:$0x73625140]  ;;  %v1328_v29 = vor.u32 %v1551_v15, %v1327_v14  ;;  %v1076_v33 = vor.u32 %v1486_v17, %v1073_v18 }
  0x37   :  { %719 = vmatpush.bf16.msrb.mxu1 %v1360_v30  ;;  %v1257_v23 = vld [vmem:[#allocation2 + $0x1f8] sm:$0xf0]  ;;  %v1564_v26 = vld [vmem:[#allocation2 + $0x2f4] sm:$0xf]  ;;  %v1514_v28 = vld [vmem:[#allocation2 + $0x164] sm:$0xf] }
  0x38   :  { %707 = vmatpush.bf16.msrb.mxu0 %v1288_v36  ;;  %1397 = vmatmul.msk.bf16.vlgmr.msrb.gmra.mxu2 %vm647_vm0, %v1661_v6  ;;  %v1385_v27 = vld [vmem:[#allocation2 + $0x2f8] sm:$0xf0]  ;;  %v43_v30 = vld.sshfl [vmem:[#allocation1 + $0x28] sm:$0xff pattern:$0x73625140]  ;;  %v1260_v36 = vor.u32 %v1532_v19, %v1257_v23 }
  0x39   :  { %758 = vmatpush.bf16.msra.mxu2 %v1108_v32  ;;  %v1185_v31 = vld [vmem:[#allocation2 + $0x168] sm:$0xf0]  ;;  %v1665_v32 = vpack.c.bf16 %v42_v22, %v42_v22  ;;  %v1546_v34 = vld [vmem:[#allocation2 + $0x264] sm:$0xf]  ;;  %v1667_v39 = vpack.c.bf16 %v43_v30, %v43_v30  ;;  %v1512_v45 = vld [vmem:[#allocation2 + $0x154] sm:$0xf] }
  0x3a   :  { %746 = vmatpush.bf16.msrb.mxu3 %v1036_v37  ;;  %v1313_v35 = vld [vmem:[#allocation2 + $0x268] sm:$0xf0]  ;;  %v1388_v37 = vor.u32 %v1564_v26, %v1385_v27  ;;  %v1530_v38 = vld [vmem:[#allocation2 + $0x1e4] sm:$0xf]  ;;  %v1188_v40 = vor.u32 %v1514_v28, %v1185_v31  ;;  %v1177_v46 = vld [vmem:[#allocation2 + $0x158] sm:$0xf0] }
  0x3b   :  { %720 = vmatpush.bf16.msrb.mxu1 %v1352_v43  ;;  %v1249_v41 = vld [vmem:[#allocation2 + $0x1e8] sm:$0xf0]  ;;  %v1562_v42 = vld [vmem:[#allocation2 + $0x2e4] sm:$0xf]  ;;  %v1544_v47 = vld [vmem:[#allocation2 + $0x254] sm:$0xf]  ;;  %v1180_v53 = vor.u32 %v1512_v45, %v1177_v46 }
  0x3c   :  { %708 = vmatpush.bf16.msrb.mxu0 %v1280_v48  ;;  %v1377_v43 = vld [vmem:[#allocation2 + $0x2e8] sm:$0xf0]  ;;  %v1305_v48 = vld [vmem:[#allocation2 + $0x258] sm:$0xf0]  ;;  %v1528_v51 = vld [vmem:[#allocation2 + $0x1d4] sm:$0xf] }
  0x3d   :  { %759 = vmatpush.bf16.msra.mxu2 %v1100_v44  ;;  %v1316_v44 = vor.u32 %v1546_v34, %v1313_v35  ;;  %v1380_v50 = vor.u32 %v1562_v42, %v1377_v43  ;;  %v1241_v54 = vld [vmem:[#allocation2 + $0x1d8] sm:$0xf0]  ;;  %v1560_v55 = vld [vmem:[#allocation2 + $0x2d4] sm:$0xf]  ;;  %v1510_v59 = vld [vmem:[#allocation2 + $0x144] sm:$0xf] }
  0x3e   :  { %747 = vmatpush.bf16.msrb.mxu3 %v1028_v49  ;;  %v1252_v49 = vor.u32 %v1530_v38, %v1249_v41  ;;  %v1369_v56 = vld [vmem:[#allocation2 + $0x2d8] sm:$0xf0]  ;;  %v1169_v60 = vld [vmem:[#allocation2 + $0x148] sm:$0xf0]  ;;  %v1542_v61 = vld [vmem:[#allocation2 + $0x244] sm:$0xf]  ;;  %v1244_v63 = vor.u32 %v1528_v51, %v1241_v54 }
  0x3f   :  { %721 = vmatpush.bf16.msrb.mxu1 %v1344_v58  ;;  %v1308_v58 = vor.u32 %v1544_v47, %v1305_v48  ;;  %v1372_v0 = vor.u32 %v1560_v55, %v1369_v56  ;;  %v1233_v3 = vld [vmem:[#allocation2 + $0x1c8] sm:$0xf0]  ;;  %v1558_v7 = vld [vmem:[#allocation2 + $0x2c4] sm:$0xf]  ;;  %v1508_v10 = vld [vmem:[#allocation2 + $0x134] sm:$0xf] }
  0x40   :  { %709 = vmatpush.bf16.msrb.mxu0 %v1272_v1  ;;  %v1526_v1 = vld [vmem:[#allocation2 + $0x1c4] sm:$0xf]  ;;  %v1361_v8 = vld [vmem:[#allocation2 + $0x2c8] sm:$0xf0]  ;;  %v1161_v11 = vld [vmem:[#allocation2 + $0x138] sm:$0xf0] }
  0x41   :  { %760 = vmatpush.bf16.msra.mxu2 %v1092_v62  ;;  %v1297_v62 = vld [vmem:[#allocation2 + $0x248] sm:$0xf0]  ;;  %v1289_v13 = vld [vmem:[#allocation2 + $0x238] sm:$0xf0]  ;;  %v1364_v14 = vor.u32 %v1558_v7, %v1361_v8  ;;  %v1524_v15 = vld [vmem:[#allocation2 + $0x1b4] sm:$0xf] }
  0x42   :  { %748 = vmatpush.bf16.msrb.mxu3 %v1020_v2  ;;  %v1172_v2 = vor.u32 %v1510_v59, %v1169_v60  ;;  %v1300_v9 = vor.u32 %v1542_v61, %v1297_v62  ;;  %v1225_v17 = vld [vmem:[#allocation2 + $0x1b8] sm:$0xf0]  ;;  %v1556_v18 = vld [vmem:[#allocation2 + $0x2b4] sm:$0xf]  ;;  %v1153_v22 = vld [vmem:[#allocation2 + $0x128] sm:$0xf0] }
  0x43   :  { %722 = vmatpush.bf16.msrb.mxu1 %v1336_v12  ;;  %v1540_v12 = vld [vmem:[#allocation2 + $0x234] sm:$0xf]  ;;  %v1353_v19 = vld [vmem:[#allocation2 + $0x2b8] sm:$0xf0]  ;;  %v1538_v23 = vld [vmem:[#allocation2 + $0x224] sm:$0xf] }
  0x44   :  { %710 = vmatpush.bf16.msrb.mxu0 %v1264_v20  ;;  %v1292_v20 = vor.u32 %v1540_v12, %v1289_v13  ;;  %v1522_v26 = vld [vmem:[#allocation2 + $0x1a4] sm:$0xf]  ;;  %v1217_v28 = vld [vmem:[#allocation2 + $0x1a8] sm:$0xf0]  ;;  %v1145_v34 = vld [vmem:[#allocation2 + $0x118] sm:$0xf0] }
  0x45   :  { %761 = vmatpush.bf16.msra.mxu2 %v1084_v16  ;;  %v1164_v16 = vor.u32 %v1508_v10, %v1161_v11  ;;  %v1345_v30 = vld [vmem:[#allocation2 + $0x2a8] sm:$0xf0]  ;;  %v1536_v35 = vld [vmem:[#allocation2 + $0x214] sm:$0xf]  ;;  %v1209_v42 = vld [vmem:[#allocation2 + $0x198] sm:$0xf0] }
  0x46   :  { %749 = vmatpush.bf16.msrb.mxu3 %v1012_v21  ;;  %v1506_v21 = vld [vmem:[#allocation2 + $0x124] sm:$0xf]  ;;  %v1552_v43 = vld [vmem:[#allocation2 + $0x294] sm:$0xf]  ;;  %v1137_v47 = vld [vmem:[#allocation2 + $0x108] sm:$0xf0] }
  0x47   :  { %723 = vmatpush.bf16.msrb.mxu1 %v1328_v29  ;;  %711 = vmatmul.bf16.vlgmr.msrb.gmra.mxu0 %v1665_v32  ;;  %v1156_v27 = vor.u32 %v1506_v21, %v1153_v22  ;;  %v1554_v29 = vld [vmem:[#allocation2 + $0x2a4] sm:$0xf]  ;;  %v1393_v51 = vld [vmem:[#allocation2 + $0x308] sm:$0xf0]  ;;  %v1583_v13 = vld [vmem:[%s1732_s2 + $0x78] sm:$0xff] }
  0x48   :  { %768 = vmatpush.bf16.msra.mxu0 %v1196_v24  ;;  %v1228_v24 = vor.u32 %v1524_v15, %v1225_v17  ;;  %v1348_v38 = vor.u32 %v1554_v29, %v1345_v30  ;;  %v1502_v46 = vld [vmem:[#allocation2 + $0x104] sm:$0xf]  ;;  %v1329_v61 = vld [vmem:[#allocation2 + $0x288] sm:$0xf0]  ;;  %v1618_v30 = vmov 1.0|1.0  }
  0x49   :  { %762 = vmatpush.bf16.msra.mxu2 %v1076_v33  ;;  %750 = vmatmul.bf16.vlgmr.msrb.gmra.mxu3 %v1650_v4  ;;  %v1236_v4 = vor.u32 %v1526_v1, %v1233_v3  ;;  %v1504_v33 = vld [vmem:[#allocation2 + $0x114] sm:$0xf]  ;;  %v1534_v48 = vld [vmem:[#allocation2 + $0x204] sm:$0xf]  ;;  %v1140_v55 = vor.u32 %v1502_v46, %v1137_v47  ;;  %v1568_v3 = vld [vmem:[%s1732_s2] sm:$0xff] }
  0x4a   :  { %794 = vmatpush.bf16.msra.mxu3 %v1324_v25  ;;  %724 = vmatmul.bf16.vlgmr.msrb.gmra.mxu1 %v1667_v39  ;;  %v1356_v25 = vor.u32 %v1556_v18, %v1353_v19  ;;  %v1148_v41 = vor.u32 %v1504_v33, %v1145_v34  ;;  %v1518_v56 = vld [vmem:[#allocation2 + $0x184] sm:$0xf]  ;;  %v1575_v1 = vld [vmem:[%s1732_s2 + $0x38] sm:$0xff] }
  0x4b   :  { %781 = vmatpush.bf16.msra.mxu1 %v1260_v36  ;;  %v1273_v36 = vld [vmem:[#allocation2 + $0x218] sm:$0xf0]  ;;  %v1550_v60 = vld [vmem:[#allocation2 + $0x284] sm:$0xf] }
  0x4c   :  { %769 = vmatpush.bf16.msra.mxu0 %v1188_v40  ;;  %763 = vmatmul.bf16.vlgmr.msra.gmra.mxu2 %v1652_v5  ;;  %v1281_v5 = vld [vmem:[#allocation2 + $0x228] sm:$0xf0]  ;;  %v1520_v40 = vld [vmem:[#allocation2 + $0x194] sm:$0xf]  ;;  %v1276_v45 = vor.u32 %v1536_v35, %v1273_v36  ;;  %v1577_v34 = vld [vmem:[%s1732_s2 + $0x48] sm:$0xff] }
  0x4d   :  { %807 = vmatpush.bf16.msrb.mxu2 %v1388_v37  ;;  %v1284_v31 = vor.u32 %v1538_v23, %v1281_v5  ;;  %v1220_v37 = vor.u32 %v1522_v26, %v1217_v28  ;;  %v1578_v28 = vld [vmem:[%s1732_s2 + $0x50] sm:$0xff]  ;;  %v1576_v36 = vld [vmem:[%s1732_s2 + $0x40] sm:$0xff] }
  0x4e   :  { %795 = vmatpush.bf16.msra.mxu3 %v1316_v44  ;;  %v1337_v44 = vld [vmem:[#allocation2 + $0x298] sm:$0xf0] }
  0x4f   :  { %782 = vmatpush.bf16.msra.mxu1 %v1252_v49  ;;  %v1265_v49 = vld [vmem:[#allocation2 + $0x208] sm:$0xf0]  ;;  %v1340_v54 = vor.u32 %v1552_v43, %v1337_v44 }
  0x50   :  { %770 = vmatpush.bf16.msra.mxu0 %v1180_v53  ;;  %v1212_v53 = vor.u32 %v1520_v40, %v1209_v42  ;;  %v1268_v59 = vor.u32 %v1534_v48, %v1265_v49 }
  0x51   :  { %808 = vmatpush.bf16.msrb.mxu2 %v1380_v50  ;;  %v1566_v50 = vld [vmem:[#allocation2 + $0x304] sm:$0xf] }
  0x52   :  { %796 = vmatpush.bf16.msra.mxu3 %v1308_v58  ;;  %v1201_v58 = vld [vmem:[#allocation2 + $0x188] sm:$0xf0]  ;;  %v1396_v62 = vor.u32 %v1566_v50, %v1393_v51 }
  0x53   :  { %783 = vmatpush.bf16.msra.mxu1 %v1244_v63  ;;  %v1204_v63 = vor.u32 %v1518_v56, %v1201_v58 }
  0x54   :  { %771 = vmatpush.bf16.msra.mxu0 %v1172_v2  ;;  %v1574_v2 = vld [vmem:[%s1732_s2 + $0x30] sm:$0xff] }
  0x55   :  { %809 = vmatpush.bf16.msrb.mxu2 %v1372_v0  ;;  %v1332_v0 = vor.u32 %v1550_v60, %v1329_v61 }
  0x56   :  { %797 = vmatpush.bf16.msra.mxu3 %v1300_v9 }
  0x57   :  { %784 = vmatpush.bf16.msra.mxu1 %v1236_v4  ;;  %v1582_v4 = vld [vmem:[%s1732_s2 + $0x70] sm:$0xff] }
  0x58   :  { %772 = vmatpush.bf16.msra.mxu0 %v1164_v16  ;;  %v1581_v16 = vld [vmem:[%s1732_s2 + $0x68] sm:$0xff] }
  0x59   :  { %810 = vmatpush.bf16.msrb.mxu2 %v1364_v14 }
  0x5a   :  { %798 = vmatpush.bf16.msra.mxu3 %v1292_v20  ;;  %v1580_v20 = vld [vmem:[%s1732_s2 + $0x60] sm:$0xff] }
  0x5b   :  { %785 = vmatpush.bf16.msra.mxu1 %v1228_v24  ;;  %v1579_v24 = vld [vmem:[%s1732_s2 + $0x58] sm:$0xff] }
  0x5c   :  { %773 = vmatpush.bf16.msra.mxu0 %v1156_v27 }
  0x5d   :  { %811 = vmatpush.bf16.msrb.mxu2 %v1356_v25 }
  0x5e   :  { %799 = vmatpush.bf16.msra.mxu3 %v1284_v31 }
  0x5f   :  { %786 = vmatpush.bf16.msra.mxu1 %v1220_v37 }
  0x60   :  { %774 = vmatpush.bf16.msra.mxu0 %v1148_v41 }
  0x61   :  { %812 = vmatpush.bf16.msrb.mxu2 %v1348_v38 }
  0x62   :  { %800 = vmatpush.bf16.msra.mxu3 %v1276_v45 }
  0x63   :  { %787 = vmatpush.bf16.msra.mxu1 %v1212_v53 }
  0x64   :  { %775 = vmatpush.bf16.msra.mxu0 %v1140_v55 }
  0x65   :  { %813 = vmatpush.bf16.msrb.mxu2 %v1340_v54 }
  0x66   :  { %801 = vmatpush.bf16.msra.mxu3 %v1268_v59 }
  0x67   :  { %788 = vmatpush.bf16.msra.mxu1 %v1204_v63  ;;  %776 = vmatmul.bf16.vlgmr.msra.gmra.mxu0 %v1646_v52  ;;  %v1573_v52 = vld [vmem:[%s1732_s2 + $0x28] sm:$0xff] }
  0x68   :  { %827 = vmatpush.bf16.msrb.mxu0 %v1396_v62  ;;  %v1619_v62 = vmov 0.0  }
  0x69   :  { %802 = vmatmul.bf16.vlgmr.msra.gmra.mxu3 %v1665_v32  ;;  %814 = vmatpush.bf16.msrb.mxu2 %v1332_v0  ;;  %v1570_v32 = vld [vmem:[%s1732_s2 + $0x10] sm:$0xff] }
  0x6a   :  { %789 = vmatmul.bf16.vlgmr.msra.gmra.mxu1 %v1648_v57  ;;  %v1572_v57 = vld [vmem:[%s1732_s2 + $0x20] sm:$0xff]  ;;  %982 = vmatpush.bf16.msrb.mxu3 %v1583_v13 }
  0x6b   :  { %969 = vmatpush.bf16.msrb.mxu1 %v1575_v1 }
  0x6c   :  { %815 = vmatmul.bf16.vlgmr.msrb.gmra.mxu2 %v1667_v39  ;;  %v1569_v39 = vld [vmem:[%s1732_s2 + $0x8] sm:$0xff] }
  0x6e   :  { %983 = vmatpush.bf16.msrb.mxu3 %v1582_v4 }
  0x6f   :  { %970 = vmatpush.bf16.msrb.mxu1 %v1574_v2 }
  0x72   :  { %984 = vmatpush.bf16.msrb.mxu3 %v1581_v16 }
  0x73   :  { %971 = vmatpush.bf16.msrb.mxu1 %v1573_v52 }
  0x76   :  { %985 = vmatpush.bf16.msrb.mxu3 %v1580_v20 }
  0x77   :  { %1398 = vmatmul.msk.bf16.vlgmr.msrb.gmra.mxu0 %vm647_vm0, %v1661_v6  ;;  %972 = vmatpush.bf16.msrb.mxu1 %v1572_v57  ;;  %v1571_v6 = vld [vmem:[%s1732_s2 + $0x18] sm:$0xff] }
  0x7a   :  { %986 = vmatpush.bf16.msrb.mxu3 %v1579_v24 }
  0x7b   :  { %973 = vmatpush.bf16.msrb.mxu1 %v1571_v6 }
  0x7e   :  { %987 = vmatpush.bf16.msrb.mxu3 %v1578_v28 }
  0x7f   :  { %974 = vmatpush.bf16.msrb.mxu1 %v1570_v32 }
  0x82   :  { %988 = vmatpush.bf16.msrb.mxu3 %v1577_v34 }
  0x83   :  { %975 = vmatpush.bf16.msrb.mxu1 %v1569_v39 }
  0x86   :  { %989 = vmatpush.bf16.msrb.mxu3 %v1576_v36 }
  0x87   :  { %976 = vmatpush.bf16.msrb.mxu1 %v1568_v3 }
  0xa4   :  { %v660_v7 = vpop.f32.mrf.mxu0 }
  0xa7   :  { %v673_v8 = vpop.f32.mrf.mxu1 }
  0xa8   :  { %v674_v17 = vadd.f32 %v673_v8, %v660_v7 }
  0xab   :  { %v686_v9 = vpop.f32.mrf.mxu2 }
  0xac   :  { %v699_v10 = vpop.f32.mrf.mxu3  ;;  %v662_v11 = vpop.f32.mrf.mxu0  ;;  %v687_v18 = vadd.f32 %v686_v9, %v674_v17 }
  0xae   :  { %v700_v21 = vadd.f32 %v699_v10, %v687_v18 }
  0xaf   :  { %v675_v12 = vpop.f32.mrf.mxu1 }
  0xb3   :  { %v688_v14 = vpop.f32.mrf.mxu2 }
  0xb4   :  { %v701_v15 = vpop.f32.mrf.mxu3 }
  0xbb   :  { %v738_v19 = vpop.f32.mrf.mxu2 }
  0xc3   :  { %v740_v27 = vpop.f32.mrf.mxu2 }
  0xc4   :  { %v712_v22 = vpop.f32.mrf.mxu0 }
  0xc5   :  { %v713_v23 = vadd.f32 %v712_v22, %v700_v21 }
  0xc7   :  { %v725_v5 = vpop.f32.mrf.mxu1 }
  0xc8   :  { %v726_v25 = vadd.f32 %v725_v5, %v713_v23 }
  0xca   :  { %v739_v26 = vadd.f32 %v738_v19, %v726_v25 }
  0xcc   :  { %vm833_vm1 = vcmp.ge.f32.partialorder %v739_v26, 100.0  ;;  %v714_v29 = vpop.f32.mrf.mxu0  ;;  %v751_v31 = vpop.f32.mrf.mxu3 }
  0xcd   :  { %vm1465_vm2 = vmpackc.low %vm833_vm1, %vm833_vm1 }
  0xce   :  { %1466 = vmatmul.msk.bf16.vlgmr.msrb.gmra.mxu1 %vm1465_vm2, %v1618_v30 }
  0xcf   :  { %v727_v33 = vpop.f32.mrf.mxu1  ;;  %v764_v35 = vpop.f32.mrf.mxu2 }
  0xd0   :  { %v765_v41 = vadd.f32 %v764_v35, %v751_v31 }
  0xd4   :  { %v753_v37 = vpop.f32.mrf.mxu3 }
  0xd7   :  { %v766_v38 = vpop.f32.mrf.mxu2 }
  0xe4   :  { %v777_v40 = vpop.f32.mrf.mxu0 }
  0xe5   :  { %v778_v43 = vadd.f32 %v777_v40, %v765_v41 }
  0xe7   :  { %v790_v42 = vpop.f32.mrf.mxu1 }
  0xe8   :  { %v791_v46 = vadd.f32 %v790_v42, %v778_v43 }
  0xec   :  { %v803_v44 = vpop.f32.mrf.mxu3  ;;  %v779_v45 = vpop.f32.mrf.mxu0 }
  0xed   :  { %v804_v48 = vadd.f32 %v803_v44, %v791_v46 }
  0xef   :  { %v816_v47 = vpop.f32.mrf.mxu2  ;;  %v792_v49 = vpop.f32.mrf.mxu1 }
  0xf0   :  { %v817_v50 = vadd.f32 %v816_v47, %v804_v48 }
  0xf4   :  { %v805_v51 = vpop.f32.mrf.mxu3  ;;  %v829_v53 = vpop.f32.mrf.mxu0 }
  0xf5   :  { %v830_v54 = vadd.f32 %v829_v53, %v817_v50 }
  0xf7   :  { %v818_v55 = vpop.f32.mrf.mxu2  ;;  %vm834_vm3 = vcmp.ge.f32.partialorder %v830_v54, 100.0 }
  0xf8   :  { %vm1467_vm4 = vmpackc.low %vm834_vm3, %vm834_vm3 }
  0xf9   :  { %1468 = vmatmul.msk.bf16.vlgmr.msrb.gmra.mxu3 %vm1467_vm4, %v1618_v30 }
  0xfc   :  { %v831_v56 = vpop.f32.mrf.mxu0 }
 0x14b   :  { %v978_v58 = vpop.f32.mrf.mxu1 }
 0x153   :  { %v980_v59 = vpop.f32.mrf.mxu1 }
 0x17c   :  { %v991_v60 = vpop.f32.mrf.mxu3 }
 0x17d   :  { %v992_v61 = vadd.f32 %v991_v60, %v978_v58 }
 0x17f   :  { %vm995_vm5 = vcmp.ge.f32.partialorder %v992_v61, 100.0 }
 0x180   :  { %v1469_v63 = vsel %vm995_vm5, 1.0, %v1619_v62 }
 0x181   :  { %v998_v0 = vpack.c.bf16 %v1469_v63, %v1469_v63 }
 0x183   :  { %999 = vst [vmem:[%s1733_s3] sm:$0x1] %v998_v0 }
 0x184   :  { %v993_v1 = vpop.f32.mrf.mxu3 }
 0x185   :  { %1004 = vsyncpa [#allocation3], 1 }

</bundles_post_ra>
